<compile_context>
chip_gen: v7x
topology: tpu7x:2x2x1
jax: 0.10.0
libtpu: 0.0.40
codegen_flags: <defaults>
</compile_context>

<pallas_src>
import functools

import jax
import jax.numpy as jnp
from jax import lax
from jax.experimental import pallas as pl
from jax.experimental.pallas import tpu as pltpu


def _round_up(a: int, b: int) -> int:
    return (a + b - 1) // b * b


def _accumulate(x_ref, w_ref, acc_ref):
    # x_ref: (tm, tk), w_ref: (tn, tk) in native [out, in] layout.
    # Contract the K axis of both operands -> (tm, tn); the MXU supports the
    # "RHS transposed" contraction natively, no data movement needed.
    acc_ref[...] += lax.dot_general(
        x_ref[...],
        w_ref[...],
        dimension_numbers=(((1,), (1,)), ((), ())),
        preferred_element_type=jnp.float32,
    )


def _linear_kernel_nobias(x_ref, w_ref, o_ref, acc_ref):
    k = pl.program_id(2)

    @pl.when(k == 0)
    def _():
        acc_ref[...] = jnp.zeros_like(acc_ref)

    _accumulate(x_ref, w_ref, acc_ref)

    @pl.when(k == pl.num_programs(2) - 1)
    def _():
        o_ref[...] = acc_ref[...].astype(o_ref.dtype)


def _linear_kernel_bias(x_ref, w_ref, b_ref, o_ref, acc_ref):
    k = pl.program_id(2)

    @pl.when(k == 0)
    def _():
        acc_ref[...] = jnp.zeros_like(acc_ref)

    _accumulate(x_ref, w_ref, acc_ref)

    @pl.when(k == pl.num_programs(2) - 1)
    def _():
        o_ref[...] = (acc_ref[...] + b_ref[...].astype(jnp.float32)).astype(o_ref.dtype)


@functools.partial(jax.jit, static_argnames=("tm", "tn", "tk"))
def pallas_linear(x, weight, bias=None, *, tm=None, tn=None, tk=None):
    """F.linear(x, weight, bias) with the matmul done in a Pallas TPU kernel.

    x      : (..., in_features)
    weight : (out_features, in_features)   (native PyTorch layout, NOT transposed)
    bias   : (out_features,) or None
    """
    *lead, K = x.shape
    N, K_w = weight.shape
    assert K_w == K, "weight.shape[1] must match x.shape[-1]"

    M = 1
    for d in lead:
        M *= d
    x2 = x.reshape(M, K)

    out_dtype = x.dtype
    # sublane alignment: 8 rows for 4-byte dtypes, 16 for 2-byte (bf16) packing
    sub = 8 if jnp.dtype(x.dtype).itemsize >= 4 else 16

    # Bounded default tiles: keep VMEM flat on every generation, feed the
    # 256-wide MXUs on v6e/v7x, and keep i/j grid extents > 1 where possible.
    if tm is None:
        tm = min(512, _round_up(M, sub))
    if tn is None:
        tn = min(256, _round_up(N, 128))
    if tk is None:
        tk = min(1024, _round_up(K, 128))

    # Zero-pad so every grid extent divides evenly; zero rows/cols contribute
    # nothing to the matmul and the bias add, and keep the output lane-dense.
    Mp, Np, Kp = _round_up(M, tm), _round_up(N, tn), _round_up(K, tk)
    if (Mp, Kp) != (M, K):
        x2 = jnp.pad(x2, ((0, Mp - M), (0, Kp - K)))
    w = weight
    if (Np, Kp) != (N, K):
        w = jnp.pad(w, ((0, Np - N), (0, Kp - K)))

    has_bias = bias is not None
    grid = (Mp // tm, Np // tn, Kp // tk)

    x_spec = pl.BlockSpec((tm, tk), lambda i, j, k: (i, k))
    w_spec = pl.BlockSpec((tn, tk), lambda i, j, k: (j, k))   # native [out, in] layout
    o_spec = pl.BlockSpec((tm, tn), lambda i, j, k: (i, j))

    in_specs = [x_spec, w_spec]
    operands = [x2, w]
    kernel = _linear_kernel_nobias
    if has_bias:
        b2 = bias.astype(jnp.float32).reshape(1, N)
        if Np != N:
            b2 = jnp.pad(b2, ((0, 0), (0, Np - N)))
        in_specs.append(pl.BlockSpec((1, tn), lambda i, j, k: (0, j)))
        operands.append(b2)
        kernel = _linear_kernel_bias

    # VMEM budget: double-buffered x / w / out tiles + resident f32 accumulator.
    itemsize_x = jnp.dtype(x2.dtype).itemsize
    itemsize_w = jnp.dtype(w.dtype).itemsize
    itemsize_o = jnp.dtype(out_dtype).itemsize
    vmem_bytes = (
        2 * (tm * tk * itemsize_x + tn * tk * itemsize_w + tm * tn * itemsize_o)
        + tm * tn * 4
        + (2 * tn * 4 if has_bias else 0)
    )
    # Raise the scoped-VMEM limit above the 16/32 MiB defaults, but stay under
    # v7x's 64 MiB physical VMEM per TensorCore.
    vmem_limit = min(max(int(vmem_bytes * 3 // 2) + (4 << 20), 32 << 20), 64 << 20)

    out2 = pl.pallas_call(
        kernel,
        out_shape=jax.ShapeDtypeStruct((Mp, Np), out_dtype),
        grid_spec=pltpu.PrefetchScalarGridSpec(
            num_scalar_prefetch=0,
            grid=grid,
            in_specs=in_specs,
            out_specs=o_spec,
            scratch_shapes=[pltpu.VMEM((tm, tn), jnp.float32)],
        ),
        compiler_params=pltpu.CompilerParams(
            dimension_semantics=("parallel", "parallel", "arbitrary"),
            vmem_limit_bytes=vmem_limit,
        ),
    )(*operands)

    out2 = out2[:M, :N]
    return out2.reshape(*lead, N)


# TODO(synk): the quantized path of the original module (element_size()==1
# weights + per-128-block `scale` dequant) is not implemented; only the
# full-precision weight path is exercised here. A v6e int8 / v7x fp8 variant
# would dequantize per weight tile inside the kernel before the dot_general.


if __name__ == "__main__":
    # Small shapes consistent with the module: batch=2, seq=8, hidden 256 -> 128
    batch, seq = 2, 8
    in_features, out_features = 256, 128

    key = jax.random.PRNGKey(0)
    kx, kw, kb, kx2, kw2, kb2 = jax.random.split(key, 6)

    x = jax.random.normal(kx, (batch, seq, in_features), dtype=jnp.float32)
    weight = jax.random.normal(kw, (out_features, in_features), dtype=jnp.float32) * 0.02
    bias = jax.random.normal(kb, (out_features,), dtype=jnp.float32) * 0.1

    # Case 1: no bias (module default)
    y_nobias = jax.block_until_ready(pallas_linear(x, weight, None))
    ref_nobias = x @ weight.T
    assert y_nobias.shape == (batch, seq, out_features)
    assert jnp.allclose(y_nobias, ref_nobias, atol=1e-4, rtol=1e-4)

    # Case 2: with bias
    y_bias = jax.block_until_ready(pallas_linear(x, weight, bias))
    ref_bias = x @ weight.T + bias
    assert jnp.allclose(y_bias, ref_bias, atol=1e-4, rtol=1e-4)

    # Case 3: non-(8,128)-divisible shapes (exercises the zero-padding path)
    M3, K3, N3 = 5, 200, 96
    x3 = jax.random.normal(kx2, (M3, K3), dtype=jnp.float32)
    w3 = jax.random.normal(kw2, (N3, K3), dtype=jnp.float32) * 0.02
    b3 = jax.random.normal(kb2, (N3,), dtype=jnp.float32) * 0.1
    y3 = jax.block_until_ready(pallas_linear(x3, w3, b3))
    assert y3.shape == (M3, N3)
    assert jnp.allclose(y3, x3 @ w3.T + b3, atol=1e-4, rtol=1e-4)

    print("KERNEL_OK")
</pallas_src>

<mosaic_0001>
module attributes {stable_mosaic.version = 11 : i64} {
  func.func @_linear_kernel_nobias(%arg0: i32, %arg1: i32, %arg2: i32, %arg3: memref<16x256xf32, #tpu.memory_space<vmem>>, %arg4: memref<128x256xf32, #tpu.memory_space<vmem>>, %arg5: memref<16x128xf32, #tpu.memory_space<vmem>>, %arg6: memref<16x128xf32, #tpu.memory_space<vmem>>) attributes {dimension_semantics = [#tpu.dimension_semantics<parallel>, #tpu.dimension_semantics<parallel>, #tpu.dimension_semantics<arbitrary>], iteration_bounds = array<i64: 1, 1, 1>, scalar_prefetch = 0 : i64, scratch_operands = 1 : i64, tpu.core_type = #tpu.core_type<tc>, window_params = [{transform_indices = @transform_0, window_bounds = array<i64: 16, 256>}, {transform_indices = @transform_1, window_bounds = array<i64: 128, 256>}, {transform_indices = @transform_2, window_bounds = array<i64: 16, 128>}]} {
    %c0_i32 = arith.constant 0 : i32
    %0 = arith.cmpi eq, %arg2, %c0_i32 : i32
    %1 = arith.extui %0 : i1 to i32
    %c0_i32_0 = arith.constant 0 : i32
    %2 = arith.cmpi ne, %1, %c0_i32_0 : i32
    scf.if %2 {
      %cst_10 = arith.constant 0.000000e+00 : f32
      %12 = vector.broadcast %cst_10 : f32 to vector<16x128xf32>
      %c0_11 = arith.constant 0 : index
      %c0_12 = arith.constant 0 : index
      %13 = vector.load %arg6[%c0_11, %c0_12] : memref<16x128xf32, #tpu.memory_space<vmem>>, vector<16x128xf32>
      tpu.vector_store %arg6[%c0_11, %c0_12], %12 {strides = array<i32>} : memref<16x128xf32, #tpu.memory_space<vmem>>, vector<16x128xf32>,
    } else {
    }
    %c0 = arith.constant 0 : index
    %c0_1 = arith.constant 0 : index
    %3 = vector.load %arg6[%c0, %c0_1] : memref<16x128xf32, #tpu.memory_space<vmem>>, vector<16x128xf32>
    %c0_2 = arith.constant 0 : index
    %c0_3 = arith.constant 0 : index
    %4 = vector.load %arg3[%c0_2, %c0_3] : memref<16x256xf32, #tpu.memory_space<vmem>>, vector<16x256xf32>
    %c0_4 = arith.constant 0 : index
    %c0_5 = arith.constant 0 : index
    %5 = vector.load %arg4[%c0_4, %c0_5] : memref<128x256xf32, #tpu.memory_space<vmem>>, vector<128x256xf32>
    %cst = arith.constant dense<0.000000e+00> : vector<16x128xf32>
    %6 = tpu.matmul %4, %5, %cst {dimension_numbers = #tpu.dot_dimension_numbers<[1], [1], [0], [0], [0, 0, 1, 0], [], []>} : vector<16x256xf32>, vector<128x256xf32>, vector<16x128xf32> -> vector<16x128xf32>
    %7 = arith.addf %3, %6 : vector<16x128xf32>
    %c0_6 = arith.constant 0 : index
    %c0_7 = arith.constant 0 : index
    %8 = vector.load %arg6[%c0_6, %c0_7] : memref<16x128xf32, #tpu.memory_space<vmem>>, vector<16x128xf32>
    tpu.vector_store %arg6[%c0_6, %c0_7], %7 {strides = array<i32>} : memref<16x128xf32, #tpu.memory_space<vmem>>, vector<16x128xf32>,
    %c0_i32_8 = arith.constant 0 : i32
    %9 = arith.cmpi eq, %arg2, %c0_i32_8 : i32
    %10 = arith.extui %9 : i1 to i32
    %c0_i32_9 = arith.constant 0 : i32
    %11 = arith.cmpi ne, %10, %c0_i32_9 : i32
    scf.if %11 {
      %c0_10 = arith.constant 0 : index
      %c0_11 = arith.constant 0 : index
      %12 = vector.load %arg6[%c0_10, %c0_11] : memref<16x128xf32, #tpu.memory_space<vmem>>, vector<16x128xf32>
      %c0_12 = arith.constant 0 : index
      %c0_13 = arith.constant 0 : index
      %13 = vector.load %arg5[%c0_12, %c0_13] : memref<16x128xf32, #tpu.memory_space<vmem>>, vector<16x128xf32>
      tpu.vector_store %arg5[%c0_12, %c0_13], %12 {strides = array<i32>} : memref<16x128xf32, #tpu.memory_space<vmem>>, vector<16x128xf32>,
    } else {
    }
    return
  }
  func.func @transform_0(%arg0: i32, %arg1: i32, %arg2: i32) -> (i32, i32) {
    %c0_i32 = arith.constant 0 : i32
    return %arg0, %arg2 : i32, i32
  }
  func.func @transform_1(%arg0: i32, %arg1: i32, %arg2: i32) -> (i32, i32) {
    %c0_i32 = arith.constant 0 : i32
    return %arg1, %arg2 : i32, i32
  }
  func.func @transform_2(%arg0: i32, %arg1: i32, %arg2: i32) -> (i32, i32) {
    %c0_i32 = arith.constant 0 : i32
    return %arg0, %arg1 : i32, i32
  }
}

</mosaic_0001>

<bundles_post_ra>
// kernel: pallas_linear.1
= control target key start
LH: loop header
LB: loop body
LE: loop exit
PB: predicated region body
PF: predicated region fallthrough
CT: control target
= control target key end

     0   :  { %7 = vsyncpa [#allocation4], 0  ;;  %s373_s0 = inlined_call_operand.hbm [shape: f32[16,256], index: 0, kind: input, shape index: {}]   ;;  %s374_s1 = inlined_call_operand.hbm [shape: f32[128,256], index: 1, kind: input, shape index: {}]   ;;  %s375_s2 = inlined_call_operand.hbm [shape: f32[16,128], index: 2, kind: output, shape index: {}]  }
   0x1   :  { %8 = vsyncpa [#allocation7], 0 }
   0x2   :  { %9 = vsyncpa [#allocation5], 0  ;;  %s315_s9 = smov [#allocation3]   ;;  %s243_s13 = scalar_lea.hbm %s373_s0, 512 }
   0x3   :  { %s15_s10 = sshll.u32 %s315_s9, 4  ;;  %p244_p0 = scmp.ne.s32.totalorder %s373_s0, %s243_s13  ;;  %s16_s10 = int_to_ptr.vmem [resolvable:$true] %s15_s10 }
   0x4   :  { %p247_p1 = scmp.lt.u32.totalorder %s243_s13, %s373_s0 }
   0x6   :  { %p249_p2 = pnand %p247_p1, %p244_p0 }
   0x8   :  { %252 = shalt.err (!%p249_p2)
}
   0x9   :  { %s253_s18 = scalar_lea.vmem %s16_s10, 512  ;;  %p258_p4 = scmp.lt.s32.totalorder %s16_s10, %s16_s10 }
   0xa   :  { %p254_p3 = scmp.ne.s32.totalorder %s16_s10, %s253_s18  ;;  %p259_p5 = scmp.lt.s32.totalorder %s253_s18, %s253_s18 }
   0xc   :  { %p260_p6 = por %p259_p5, %p258_p4 }
   0xe   :  { %p261_p7 = pnand %p260_p6, %p254_p3 }
  0x10   :  { %264 = shalt.err (!%p261_p7)
}
  0x11   :  { %s316_s19 = smov 256   ;;  %s317_s20 = smov 16  }
  0x12   :  { %21 = dma.hbm_to_vmem [thread:$0]  %s373_s0, 512, %s16_s10, [#allocation4], %s316_s19, %s316_s19, %s317_s20  }
  0x13   :  { %s318_s23 = smov [#allocation6]   ;;  %s265_s27 = scalar_lea.hbm %s374_s1, 4096 }
  0x14   :  { %s27_s24 = sshll.u32 %s318_s23, 4  ;;  %p266_p8 = scmp.ne.s32.totalorder %s374_s1, %s265_s27  ;;  %s28_s24 = int_to_ptr.vmem [resolvable:$true] %s27_s24 }
  0x15   :  { %p269_p9 = scmp.lt.u32.totalorder %s265_s27, %s374_s1 }
  0x17   :  { %p271_p10 = pnand %p269_p9, %p266_p8 }
  0x19   :  { %274 = shalt.err (!%p271_p10)
}
  0x1a   :  { %s275_s4 = scalar_lea.vmem %s28_s24, 4096  ;;  %p280_p12 = scmp.lt.s32.totalorder %s28_s24, %s28_s24 }
  0x1b   :  { %p276_p11 = scmp.ne.s32.totalorder %s28_s24, %s275_s4  ;;  %p281_p13 = scmp.lt.s32.totalorder %s275_s4, %s275_s4 }
  0x1d   :  { %p282_p0 = por %p281_p13, %p280_p12 }
  0x1f   :  { %p283_p1 = pnand %p282_p0, %p276_p11 }
  0x21   :  { %286 = shalt.err (!%p283_p1)
}
  0x22   :  { %33 = dma.hbm_to_vmem [thread:$0]  %s374_s1, 4096, %s28_s24, [#allocation7], %s316_s19, %s316_s19, %s317_s20  }
  0x23   :  { %309 = dma.done.wait [#allocation4], 512  }
  0x24   :  { %310 = vsyncadd [#allocation4], 4294966784 }
  0x25   :  { %311 = dma.done.wait [#allocation7], 4096  }
  0x26   :  { %312 = vsyncadd [#allocation7], 4294963200  ;;  %v53_v0 = vld [vmem:[#allocation6 + $0x8] sm:$0xff]  ;;  %v55_v1 = vld [vmem:[#allocation6 + $0x18] sm:$0xff]  ;;  %s319_s1 = smov [#allocation8]  }
  0x27   :  { %v52_v2 = vld [vmem:[#allocation6] sm:$0xff]  ;;  %v188_v3 = vpack.c.bf16 %v55_v1, %v53_v0  ;;  %v54_v4 = vld [vmem:[#allocation6 + $0x10] sm:$0xff]  ;;  %v57_v5 = vld [vmem:[#allocation6 + $0x28] sm:$0xff]  ;;  %s175_s6 = sshll.u32 %s319_s1, 4  ;;  %s176_s6 = int_to_ptr.vmem [resolvable:$true] %s175_s6 }
  0x28   :  { %v59_v6 = vld [vmem:[#allocation6 + $0x38] sm:$0xff]  ;;  %v190_v7 = vpack.c.bf16 %v54_v4, %v52_v2  ;;  %v56_v9 = vld [vmem:[#allocation6 + $0x20] sm:$0xff]  ;;  %v58_v10 = vld [vmem:[#allocation6 + $0x30] sm:$0xff]  ;;  %s287_s7 = scalar_lea.vmem %s176_s6, 256  ;;  %p292_p3 = scmp.lt.s32.totalorder %s176_s6, %s176_s6 }
  0x29   :  { %v192_v8 = vpack.c.bf16 %v59_v6, %v57_v5  ;;  %189 = vmatprep.subr.bf16.mxu0 %v188_v3  ;;  %220 = vmatprep.subr.bf16.mxu1 %v188_v3  ;;  %v61_v11 = vld [vmem:[#allocation6 + $0x48] sm:$0xff]  ;;  %v63_v12 = vld [vmem:[#allocation6 + $0x58] sm:$0xff]  ;;  %v194_v13 = vpack.c.bf16 %v58_v10, %v56_v9  ;;  %v60_v17 = vld [vmem:[#allocation6 + $0x40] sm:$0xff]  ;;  %p288_p2 = scmp.ne.s32.totalorder %s176_s6, %s287_s7  ;;  %p293_p4 = scmp.lt.s32.totalorder %s287_s7, %s287_s7 }
  0x2a   :  { %191 = vmatpush1.bf16.xpose.msra.mxu0 %v190_v7  ;;  %228 = vmatpush1.bf16.xpose.msra.mxu1 %v190_v7  ;;  %v196_v14 = vpack.c.bf16 %v63_v12, %v61_v11  ;;  %v49_v15 = vld [vmem:[#allocation3 + $0x8] sm:$0xff]  ;;  %v51_v16 = vld [vmem:[#allocation3 + $0x18] sm:$0xff]  ;;  %v62_v18 = vld [vmem:[#allocation6 + $0x50] sm:$0xff] }
  0x2b   :  { %193 = vmatprep.subr.bf16.mxu0 %v192_v8  ;;  %221 = vmatprep.subr.bf16.mxu1 %v192_v8  ;;  %v65_v19 = vld [vmem:[#allocation6 + $0x68] sm:$0xff]  ;;  %v67_v20 = vld [vmem:[#allocation6 + $0x78] sm:$0xff]  ;;  %v198_v21 = vpack.c.bf16 %v62_v18, %v60_v17  ;;  %v64_v23 = vld [vmem:[#allocation6 + $0x60] sm:$0xff]  ;;  %p294_p5 = por %p293_p4, %p292_p3 }
  0x2c   :  { %148 = vmatprep.mubr.f32.mxu0 %v49_v15  ;;  %153 = vmatprep.mubr.f32.mxu1 %v51_v16  ;;  %v200_v22 = vpack.c.bf16 %v67_v20, %v65_v19  ;;  %v66_v24 = vld [vmem:[#allocation6 + $0x70] sm:$0xff]  ;;  %v69_v25 = vld [vmem:[#allocation6 + $0x88] sm:$0xff]  ;;  %v71_v26 = vld [vmem:[#allocation6 + $0x98] sm:$0xff] }
  0x2d   :  { %v202_v27 = vpack.c.bf16 %v66_v24, %v64_v23  ;;  %v204_v28 = vpack.c.bf16 %v71_v26, %v69_v25  ;;  %v68_v29 = vld [vmem:[#allocation6 + $0x80] sm:$0xff]  ;;  %v70_v30 = vld [vmem:[#allocation6 + $0x90] sm:$0xff]  ;;  %v73_v31 = vld [vmem:[#allocation6 + $0xa8] sm:$0xff]  ;;  %p295_p6 = pnand %p294_p5, %p288_p2 }
  0x2e   :  { %v75_v32 = vld [vmem:[#allocation6 + $0xb8] sm:$0xff]  ;;  %v206_v33 = vpack.c.bf16 %v70_v30, %v68_v29  ;;  %v72_v35 = vld [vmem:[#allocation6 + $0xa0] sm:$0xff]  ;;  %v74_v36 = vld [vmem:[#allocation6 + $0xb0] sm:$0xff] }
  0x2f   :  { %v208_v34 = vpack.c.bf16 %v75_v32, %v73_v31  ;;  %v77_v37 = vld [vmem:[#allocation6 + $0xc8] sm:$0xff]  ;;  %v79_v38 = vld [vmem:[#allocation6 + $0xd8] sm:$0xff]  ;;  %v210_v39 = vpack.c.bf16 %v74_v36, %v72_v35  ;;  %v76_v41 = vld [vmem:[#allocation6 + $0xc0] sm:$0xff] }
  0x30   :  { %v212_v40 = vpack.c.bf16 %v79_v38, %v77_v37  ;;  %v78_v42 = vld [vmem:[#allocation6 + $0xd0] sm:$0xff]  ;;  %v81_v43 = vld [vmem:[#allocation6 + $0xe8] sm:$0xff]  ;;  %v83_v44 = vld [vmem:[#allocation6 + $0xf8] sm:$0xff] }
  0x31   :  { %v214_v45 = vpack.c.bf16 %v78_v42, %v76_v41  ;;  %v216_v46 = vpack.c.bf16 %v83_v44, %v81_v43  ;;  %v80_v47 = vld [vmem:[#allocation6 + $0xe0] sm:$0xff]  ;;  %v82_v48 = vld [vmem:[#allocation6 + $0xf0] sm:$0xff] }
  0x32   :  { %195 = vmatpush1.bf16.xpose.msra.mxu0 %v194_v13  ;;  %229 = vmatpush1.bf16.xpose.msra.mxu1 %v194_v13  ;;  %v218_v49 = vpack.c.bf16 %v82_v48, %v80_v47  ;;  %v48_v50 = vld [vmem:[#allocation3] sm:$0xff]  ;;  %v50_v51 = vld [vmem:[#allocation3 + $0x10] sm:$0xff] }
  0x33   :  { %197 = vmatprep.subr.bf16.mxu0 %v196_v14  ;;  %222 = vmatprep.subr.bf16.mxu1 %v196_v14 }
  0x3a   :  { %199 = vmatpush1.bf16.xpose.msra.mxu0 %v198_v21  ;;  %230 = vmatpush1.bf16.xpose.msra.mxu1 %v198_v21 }
  0x3b   :  { %201 = vmatprep.subr.bf16.mxu0 %v200_v22  ;;  %223 = vmatprep.subr.bf16.mxu1 %v200_v22 }
  0x42   :  { %203 = vmatpush1.bf16.xpose.msra.mxu0 %v202_v27  ;;  %231 = vmatpush1.bf16.xpose.msra.mxu1 %v202_v27 }
  0x43   :  { %205 = vmatprep.subr.bf16.mxu0 %v204_v28  ;;  %224 = vmatprep.subr.bf16.mxu1 %v204_v28 }
  0x4a   :  { %207 = vmatpush1.bf16.xpose.msra.mxu0 %v206_v33  ;;  %232 = vmatpush1.bf16.xpose.msra.mxu1 %v206_v33 }
  0x4b   :  { %209 = vmatprep.subr.bf16.mxu0 %v208_v34  ;;  %225 = vmatprep.subr.bf16.mxu1 %v208_v34 }
  0x52   :  { %211 = vmatpush1.bf16.xpose.msra.mxu0 %v210_v39  ;;  %233 = vmatpush1.bf16.xpose.msra.mxu1 %v210_v39 }
  0x53   :  { %213 = vmatprep.subr.bf16.mxu0 %v212_v40  ;;  %226 = vmatprep.subr.bf16.mxu1 %v212_v40 }
  0x5a   :  { %215 = vmatpush1.bf16.xpose.msra.mxu0 %v214_v45  ;;  %234 = vmatpush1.bf16.xpose.msra.mxu1 %v214_v45 }
  0x5b   :  { %217 = vmatprep.subr.bf16.mxu0 %v216_v46  ;;  %227 = vmatprep.subr.bf16.mxu1 %v216_v46 }
  0x62   :  { %219 = vmatpush1.bf16.xpose.msra.mxu0 %v218_v49  ;;  %235 = vmatpush1.bf16.xpose.msra.mxu1 %v218_v49 }
  0x69   :  { %149 = vmatmul.mubr.f32.vlgmr.msra.gmra.mrb[0].mxu0 %v48_v50  ;;  %154 = vmatmul.mubr.f32.vlgmr.msra.gmra.mrb[0].mxu1 %v50_v51 }
 0x13c   :  { %v150_v52 = vpop.f32.mrb[0].mxu0  ;;  %v155_v53 = vpop.f32.mrb[0].mxu1 }
 0x13d   :  { %168 = vst [vmem:[#allocation8] sm:$0xff] %v150_v52  ;;  %169 = vst [vmem:[#allocation8 + $0x8] sm:$0xff] %v155_v53  ;;  %v152_v54 = vpop.f32.mrb[1].mxu0  ;;  %v157_v55 = vpop.f32.mrb[1].mxu1 }
 0x13e   :  { %298 = shalt.err (!%p295_p6)
}
 0x13f   :  { %s299_s10 = scalar_lea.hbm %s375_s2, 256 }
 0x140   :  { %p300_p7 = scmp.ne.s32.totalorder %s375_s2, %s299_s10  ;;  %p303_p8 = scmp.lt.u32.totalorder %s299_s10, %s375_s2 }
 0x142   :  { %p305_p9 = pnand %p303_p8, %p300_p7 }
 0x144   :  { %308 = shalt.err (!%p305_p9)
}
 0x145   :  { %s320_s15 = smov 128   ;;  %s321_s16 = smov 8  }
 0x146   :  { %181 = dma.vmem_to_hbm [thread:$0]  %s176_s6, 256, %s375_s2, [#allocation5], %s320_s15, %s320_s15, %s321_s16  }
 0x147   :  { %313 = dma.done.wait [#allocation5], 256  }
 0x148   :  { %314 = vsyncadd [#allocation5], 4294967040 }
 0x149   :  { %185 = vsyncpa [#allocation4], 1 }
 0x14a   :  { %186 = vsyncpa [#allocation7], 1 }
 0x14b   :  { %187 = vsyncpa [#allocation5], 1 }

</bundles_post_ra>
